<compile_context>
chip_gen: v7x
topology: tpu7x:2x2x1
jax: 0.10.0
libtpu: 0.0.40
codegen_flags: <defaults>
</compile_context>

<pallas_src>
import jax
import jax.numpy as jnp
from jax.experimental import pallas as pl
from jax.experimental.pallas import tpu as pltpu

FEAT = 512       # CLIP feature dim
HID = 256        # projection dim
NUM_CLASSES = 8
NC_LANES = 128   # lane-dense (padded) output width


def _round_up(x, m):
    return (x + m - 1) // m * m


def _choose_tb(b):
    """Batch tile size.  `b` is already a multiple of 8."""
    if b >= 2048:
        return 512          # ~85% of mem-bound roofline; ~4-7 MiB/step VMEM
    if b >= 512:
        return 256
    if b >= 256:
        return 128
    if b >= 64:
        # >=2 grid steps so the "parallel" axis shards across v7x's 2 TCs;
        # harmless on single-TC v5e/v6e.
        return _round_up((b + 1) // 2, 8)
    return b                # one small tile


def _fusion_kernel(img_ref, txt_ref,
                   wi_ref, bi_ref,
                   wt_ref, bt_ref,
                   wad_img_ref, wad_txt_ref, bad_ref,
                   wf_ref, bf_ref,
                   out_ref):
    # Features arrive in their storage dtype (f32 or bf16); cast to bf16 here
    # on the VPU (free under the kernel's memory-bound slack).
    img = img_ref[...].astype(jnp.bfloat16)          # (TB, 512)
    txt = txt_ref[...].astype(jnp.bfloat16)          # (TB, 512)

    # image / text projections + ReLU (bf16 MXU, f32 accumulation)
    image_out = jnp.maximum(
        jnp.dot(img, wi_ref[...], preferred_element_type=jnp.float32)
        + bi_ref[...], 0.0)                           # (TB, 256) f32
    text_out = jnp.maximum(
        jnp.dot(txt, wt_ref[...], preferred_element_type=jnp.float32)
        + bt_ref[...], 0.0)                           # (TB, 256) f32

    # 2-way softmax == sigmoid of the logit difference.  Done on VPU + XLU
    # (a 2-lane-wide MXU result would waste the unit):
    #   d = <image_out, wa_img0 - wa_img1> + <text_out, wa_txt0 - wa_txt1> + dba
    d = (jnp.sum(image_out * wad_img_ref[...], axis=-1, keepdims=True)
         + jnp.sum(text_out * wad_txt_ref[...], axis=-1, keepdims=True)
         + bad_ref[0:1, 0:1])                         # (TB, 1)
    image_w = pl.reciprocal(1.0 + jnp.exp(-d), approx=True)   # sigmoid(d), EUP
    text_w = 1.0 - image_w

    fused = image_w * image_out + text_w * text_out   # (TB, 256) f32

    # fusion classifier: bf16 MXU matmul into lane-dense (TB, 128) bf16 output
    out_ref[...] = (jnp.dot(fused.astype(jnp.bfloat16), wf_ref[...],
                            preferred_element_type=jnp.float32)
                    + bf_ref[...]).astype(out_ref.dtype)


def pack_params(params):
    """One-time packing of weights (bf16 casts, lane padding, logit-diff)."""
    wi, bi, wt, bt, wa, ba, wf, bf = params
    num_classes = wf.shape[1]
    nc_pad = max(NC_LANES, _round_up(num_classes, NC_LANES))

    # lane-dense output: pad fc_fusion to 128 lanes, real classes sliced later
    wf_p = jnp.zeros((HID, nc_pad), jnp.bfloat16)
    wf_p = wf_p.at[:, :num_classes].set(wf.astype(jnp.bfloat16))
    bf_p = jnp.zeros((1, nc_pad), jnp.float32).at[:, :num_classes].set(bf)

    # attention logit DIFFERENCE weights per modality (softmax2 == sigmoid)
    wad_img = (wa[:HID, 0] - wa[:HID, 1]).reshape(1, HID).astype(jnp.float32)
    wad_txt = (wa[HID:, 0] - wa[HID:, 1]).reshape(1, HID).astype(jnp.float32)
    bad = (ba[:, 0] - ba[:, 1]).reshape(1, 1).astype(jnp.float32)

    return dict(
        wi=wi.astype(jnp.bfloat16), bi=bi.astype(jnp.float32),
        wt=wt.astype(jnp.bfloat16), bt=bt.astype(jnp.float32),
        wad_img=wad_img, wad_txt=wad_txt, bad=bad,
        wf=wf_p, bf=bf_p,
        num_classes=num_classes, nc_pad=nc_pad)


def multimodal_classifier_forward(image_features, text_features, packed):
    """image_features, text_features: (B, 512) float32 or bfloat16."""
    B = image_features.shape[0]
    num_classes = packed["num_classes"]
    nc_pad = packed["nc_pad"]

    # pad by at most 7 rows (multiple-of-8 sublane requirement); the big
    # full-tile jnp.pad of the old version is gone -- ragged last block is
    # handled by the grid and masked stores.
    B8 = _round_up(max(B, 8), 8)
    if B8 != B:
        pad = ((0, B8 - B), (0, 0))
        image_features = jnp.pad(image_features, pad)
        text_features = jnp.pad(text_features, pad)

    TB = _choose_tb(B8)
    grid = (pl.cdiv(B8, TB),)

    feat_spec = pl.BlockSpec((TB, FEAT), lambda i: (i, 0))
    out_spec = pl.BlockSpec((TB, nc_pad), lambda i: (i, 0))

    def full_spec(arr):
        shape = arr.shape
        return pl.BlockSpec(shape, lambda i: tuple(0 for _ in shape))

    feat_bytes = jnp.dtype(image_features.dtype).itemsize
    flops = (2 * B8 * FEAT * HID * 2            # two projections
             + 2 * B8 * HID * nc_pad            # fusion matmul
             + 2 * 2 * B8 * HID)                # attention diff reductions
    bytes_accessed = (2 * B8 * FEAT * feat_bytes                    # features
                      + 2 * FEAT * HID * 2 + HID * nc_pad * 2       # bf16 W
                      + (2 * HID + nc_pad + 2 * HID + 1) * 4        # biases/diff
                      + B8 * nc_pad * 2)                            # bf16 out

    out = pl.pallas_call(
        _fusion_kernel,
        out_shape=jax.ShapeDtypeStruct((B8, nc_pad), jnp.bfloat16),
        grid_spec=pltpu.PrefetchScalarGridSpec(
            num_scalar_prefetch=0,
            grid=grid,
            in_specs=[
                feat_spec,                               # image features
                feat_spec,                               # text features
                full_spec(packed["wi"]), full_spec(packed["bi"]),
                full_spec(packed["wt"]), full_spec(packed["bt"]),
                full_spec(packed["wad_img"]), full_spec(packed["wad_txt"]),
                full_spec(packed["bad"]),
                full_spec(packed["wf"]), full_spec(packed["bf"]),
            ],
            out_specs=out_spec,
        ),
        compiler_params=pltpu.CompilerParams(
            dimension_semantics=("parallel",)),
        cost_estimate=pl.CostEstimate(
            flops=int(flops),
            transcendentals=int(B8),
            bytes_accessed=int(bytes_accessed)),
    )(image_features, text_features,
      packed["wi"], packed["bi"], packed["wt"], packed["bt"],
      packed["wad_img"], packed["wad_txt"], packed["bad"],
      packed["wf"], packed["bf"])

    # slice out the real classes / rows; cast back to f32 for the consumer
    # (tiny: reads the bf16 lane-dense slab once, writes B x num_classes).
    return out[:B, :num_classes].astype(jnp.float32)


def init_params(key, num_classes=NUM_CLASSES):
    """Deterministic init mirroring the nn.Linear shapes (stored transposed)."""
    ks = jax.random.split(key, 8)
    scale = 0.02
    wi = scale * jax.random.normal(ks[0], (FEAT, HID), jnp.float32)         # fc_image
    bi = scale * jax.random.normal(ks[1], (1, HID), jnp.float32)
    wt = scale * jax.random.normal(ks[2], (FEAT, HID), jnp.float32)         # fc_text
    bt = scale * jax.random.normal(ks[3], (1, HID), jnp.float32)
    wa = scale * jax.random.normal(ks[4], (2 * HID, 2), jnp.float32)        # attention_weights
    ba = scale * jax.random.normal(ks[5], (1, 2), jnp.float32)
    wf = scale * jax.random.normal(ks[6], (HID, num_classes), jnp.float32)  # fc_fusion
    bf = scale * jax.random.normal(ks[7], (1, num_classes), jnp.float32)
    return (wi, bi, wt, bt, wa, ba, wf, bf)


def reference_forward(image_features, text_features, params):
    """Pure-JAX (f32) reference matching the PyTorch forward semantics."""
    wi, bi, wt, bt, wa, ba, wf, bf = params
    image_out = jax.nn.relu(image_features @ wi + bi)
    text_out = jax.nn.relu(text_features @ wt + bt)
    combined = jnp.concatenate([image_out, text_out], axis=1)
    scores = jax.nn.softmax(combined @ wa + ba, axis=1)
    fused = scores[:, 0:1] * image_out + scores[:, 1:2] * text_out
    return fused @ wf + bf


if __name__ == "__main__":
    key = jax.random.PRNGKey(0)
    k_img, k_txt, k_par = jax.random.split(key, 3)

    B = 16
    # stand-ins for CLIP image / text embeddings
    image_features = jax.random.normal(k_img, (B, FEAT), jnp.float32)
    text_features = jax.random.normal(k_txt, (B, FEAT), jnp.float32)

    params = init_params(k_par, NUM_CLASSES)
    packed = pack_params(params)

    out = multimodal_classifier_forward(image_features, text_features, packed)
    out = jax.block_until_ready(out)

    ref = reference_forward(image_features, text_features, params)
    assert out.shape == (B, NUM_CLASSES)
    # bf16 matmul inputs / bf16 output store (f32 accumulation) -> loosened tol
    assert jnp.allclose(out, ref, atol=3e-2, rtol=3e-2), "mismatch vs reference"

    print("KERNEL_OK")
</pallas_src>

<mosaic_0001>
module attributes {stable_mosaic.version = 11 : i64} {
  func.func @_fusion_kernel(%arg0: i32, %arg1: memref<16x512xf32, #tpu.memory_space<vmem>>, %arg2: memref<16x512xf32, #tpu.memory_space<vmem>>, %arg3: memref<512x256xbf16, #tpu.memory_space<vmem>>, %arg4: memref<1x256xf32, #tpu.memory_space<vmem>>, %arg5: memref<512x256xbf16, #tpu.memory_space<vmem>>, %arg6: memref<1x256xf32, #tpu.memory_space<vmem>>, %arg7: memref<1x256xf32, #tpu.memory_space<vmem>>, %arg8: memref<1x256xf32, #tpu.memory_space<vmem>>, %arg9: memref<1x1xf32, #tpu.memory_space<vmem>>, %arg10: memref<256x128xbf16, #tpu.memory_space<vmem>>, %arg11: memref<1x128xf32, #tpu.memory_space<vmem>>, %arg12: memref<16x128xbf16, #tpu.memory_space<vmem>>) attributes {dimension_semantics = [#tpu.dimension_semantics<parallel>], iteration_bounds = array<i64: 1>, scalar_prefetch = 0 : i64, scratch_operands = 0 : i64, tpu.core_type = #tpu.core_type<tc>, window_params = [{transform_indices = @transform_0, window_bounds = array<i64: 16, 512>}, {transform_indices = @transform_1, window_bounds = array<i64: 16, 512>}, {pipeline_mode = #tpu.pipeline_mode<synchronous>, transform_indices = @transform_2, window_bounds = array<i64: 512, 256>}, {pipeline_mode = #tpu.pipeline_mode<synchronous>, transform_indices = @transform_3, window_bounds = array<i64: 1, 256>}, {pipeline_mode = #tpu.pipeline_mode<synchronous>, transform_indices = @transform_4, window_bounds = array<i64: 512, 256>}, {pipeline_mode = #tpu.pipeline_mode<synchronous>, transform_indices = @transform_5, window_bounds = array<i64: 1, 256>}, {pipeline_mode = #tpu.pipeline_mode<synchronous>, transform_indices = @transform_6, window_bounds = array<i64: 1, 256>}, {pipeline_mode = #tpu.pipeline_mode<synchronous>, transform_indices = @transform_7, window_bounds = array<i64: 1, 256>}, {pipeline_mode = #tpu.pipeline_mode<synchronous>, transform_indices = @transform_8, window_bounds = array<i64: 1, 1>}, {pipeline_mode = #tpu.pipeline_mode<synchronous>, transform_indices = @transform_9, window_bounds = array<i64: 256, 128>}, {pipeline_mode = #tpu.pipeline_mode<synchronous>, transform_indices = @transform_10, window_bounds = array<i64: 1, 128>}, {transform_indices = @transform_11, window_bounds = array<i64: 16, 128>}]} {
    %c0 = arith.constant 0 : index
    %c0_0 = arith.constant 0 : index
    %0 = vector.load %arg1[%c0, %c0_0] : memref<16x512xf32, #tpu.memory_space<vmem>>, vector<16x512xf32>
    %1 = arith.truncf %0 : vector<16x512xf32> to vector<16x512xbf16>
    %c0_1 = arith.constant 0 : index
    %c0_2 = arith.constant 0 : index
    %2 = vector.load %arg2[%c0_1, %c0_2] : memref<16x512xf32, #tpu.memory_space<vmem>>, vector<16x512xf32>
    %3 = arith.truncf %2 : vector<16x512xf32> to vector<16x512xbf16>
    %c0_3 = arith.constant 0 : index
    %c0_4 = arith.constant 0 : index
    %4 = vector.load %arg3[%c0_3, %c0_4] : memref<512x256xbf16, #tpu.memory_space<vmem>>, vector<512x256xbf16>
    %cst = arith.constant dense<0.000000e+00> : vector<16x256xf32>
    %5 = tpu.matmul %1, %4, %cst {dimension_numbers = #tpu.dot_dimension_numbers<[1], [0], [0], [1], [0, 0, 1, 1], [], []>} : vector<16x512xbf16>, vector<512x256xbf16>, vector<16x256xf32> -> vector<16x256xf32>
    %c0_5 = arith.constant 0 : index
    %c0_6 = arith.constant 0 : index
    %6 = vector.load %arg4[%c0_5, %c0_6] : memref<1x256xf32, #tpu.memory_space<vmem>>, vector<1x256xf32>
    %7 = vector.broadcast %6 : vector<1x256xf32> to vector<16x256xf32>
    %8 = arith.addf %5, %7 : vector<16x256xf32>
    %cst_7 = arith.constant 0.000000e+00 : f32
    %9 = vector.broadcast %cst_7 : f32 to vector<16x256xf32>
    %10 = arith.maximumf %8, %9 : vector<16x256xf32>
    %c0_8 = arith.constant 0 : index
    %c0_9 = arith.constant 0 : index
    %11 = vector.load %arg5[%c0_8, %c0_9] : memref<512x256xbf16, #tpu.memory_space<vmem>>, vector<512x256xbf16>
    %cst_10 = arith.constant dense<0.000000e+00> : vector<16x256xf32>
    %12 = tpu.matmul %3, %11, %cst_10 {dimension_numbers = #tpu.dot_dimension_numbers<[1], [0], [0], [1], [0, 0, 1, 1], [], []>} : vector<16x512xbf16>, vector<512x256xbf16>, vector<16x256xf32> -> vector<16x256xf32>
    %c0_11 = arith.constant 0 : index
    %c0_12 = arith.constant 0 : index
    %13 = vector.load %arg6[%c0_11, %c0_12] : memref<1x256xf32, #tpu.memory_space<vmem>>, vector<1x256xf32>
    %14 = vector.broadcast %13 : vector<1x256xf32> to vector<16x256xf32>
    %15 = arith.addf %12, %14 : vector<16x256xf32>
    %cst_13 = arith.constant 0.000000e+00 : f32
    %16 = vector.broadcast %cst_13 : f32 to vector<16x256xf32>
    %17 = arith.maximumf %15, %16 : vector<16x256xf32>
    %c0_14 = arith.constant 0 : index
    %c0_15 = arith.constant 0 : index
    %18 = vector.load %arg7[%c0_14, %c0_15] : memref<1x256xf32, #tpu.memory_space<vmem>>, vector<1x256xf32>
    %19 = vector.broadcast %18 : vector<1x256xf32> to vector<16x256xf32>
    %20 = arith.mulf %10, %19 : vector<16x256xf32>
    %cst_16 = arith.constant dense<0.000000e+00> : vector<16xf32>
    %21 = vector.multi_reduction <add>, %20, %cst_16 [1] : vector<16x256xf32> to vector<16xf32>
    %22 = vector.shape_cast %21 : vector<16xf32> to vector<16x1xf32>
    %c0_17 = arith.constant 0 : index
    %c0_18 = arith.constant 0 : index
    %23 = vector.load %arg8[%c0_17, %c0_18] : memref<1x256xf32, #tpu.memory_space<vmem>>, vector<1x256xf32>
    %24 = vector.broadcast %23 : vector<1x256xf32> to vector<16x256xf32>
    %25 = arith.mulf %17, %24 : vector<16x256xf32>
    %cst_19 = arith.constant dense<0.000000e+00> : vector<16xf32>
    %26 = vector.multi_reduction <add>, %25, %cst_19 [1] : vector<16x256xf32> to vector<16xf32>
    %27 = vector.shape_cast %26 : vector<16xf32> to vector<16x1xf32>
    %28 = arith.addf %22, %27 : vector<16x1xf32>
    %c0_20 = arith.constant 0 : index
    %c0_21 = arith.constant 0 : index
    %29 = vector.load %arg9[%c0_20, %c0_21] : memref<1x1xf32, #tpu.memory_space<vmem>>, vector<1x1xf32>
    %30 = vector.broadcast %29 : vector<1x1xf32> to vector<16x1xf32>
    %31 = arith.addf %28, %30 : vector<16x1xf32>
    %cst_22 = arith.constant 0.000000e+00 : f32
    %32 = vector.broadcast %cst_22 : f32 to vector<16x1xf32>
    %33 = arith.subf %32, %31 : vector<16x1xf32>
    %34 = math.exp %33 : vector<16x1xf32>
    %cst_23 = arith.constant 1.000000e+00 : f32
    %35 = vector.broadcast %cst_23 : f32 to vector<16x1xf32>
    %36 = arith.addf %35, %34 : vector<16x1xf32>
    %37 = tpu.reciprocal %36 {approx = true} : vector<16x1xf32> -> vector<16x1xf32>
    %cst_24 = arith.constant 1.000000e+00 : f32
    %38 = vector.broadcast %cst_24 : f32 to vector<16x1xf32>
    %39 = arith.subf %38, %37 : vector<16x1xf32>
    %40 = vector.broadcast %37 : vector<16x1xf32> to vector<16x256xf32>
    %41 = arith.mulf %40, %10 : vector<16x256xf32>
    %42 = vector.broadcast %39 : vector<16x1xf32> to vector<16x256xf32>
    %43 = arith.mulf %42, %17 : vector<16x256xf32>
    %44 = arith.addf %41, %43 : vector<16x256xf32>
    %45 = arith.truncf %44 : vector<16x256xf32> to vector<16x256xbf16>
    %c0_25 = arith.constant 0 : index
    %c0_26 = arith.constant 0 : index
    %46 = vector.load %arg10[%c0_25, %c0_26] : memref<256x128xbf16, #tpu.memory_space<vmem>>, vector<256x128xbf16>
    %cst_27 = arith.constant dense<0.000000e+00> : vector<16x128xf32>
    %47 = tpu.matmul %45, %46, %cst_27 {dimension_numbers = #tpu.dot_dimension_numbers<[1], [0], [0], [1], [0, 0, 1, 1], [], []>} : vector<16x256xbf16>, vector<256x128xbf16>, vector<16x128xf32> -> vector<16x128xf32>
    %c0_28 = arith.constant 0 : index
    %c0_29 = arith.constant 0 : index
    %48 = vector.load %arg11[%c0_28, %c0_29] : memref<1x128xf32, #tpu.memory_space<vmem>>, vector<1x128xf32>
    %49 = vector.broadcast %48 : vector<1x128xf32> to vector<16x128xf32>
    %50 = arith.addf %47, %49 : vector<16x128xf32>
    %51 = arith.truncf %50 : vector<16x128xf32> to vector<16x128xbf16>
    %c0_30 = arith.constant 0 : index
    %c0_31 = arith.constant 0 : index
    %52 = vector.load %arg12[%c0_30, %c0_31] : memref<16x128xbf16, #tpu.memory_space<vmem>>, vector<16x128xbf16>
    tpu.vector_store %arg12[%c0_30, %c0_31], %51 {strides = array<i32>} : memref<16x128xbf16, #tpu.memory_space<vmem>>, vector<16x128xbf16>,
    return
  }
  func.func @transform_0(%arg0: i32) -> (i32, i32) {
    %c0_i32 = arith.constant 0 : i32
    %c0_i32_0 = arith.constant 0 : i32
    return %arg0, %c0_i32 : i32, i32
  }
  func.func @transform_1(%arg0: i32) -> (i32, i32) {
    %c0_i32 = arith.constant 0 : i32
    %c0_i32_0 = arith.constant 0 : i32
    return %arg0, %c0_i32 : i32, i32
  }
  func.func @transform_2(%arg0: i32) -> (i32, i32) {
    %c0_i32 = arith.constant 0 : i32
    %c0_i32_0 = arith.constant 0 : i32
    %c0_i32_1 = arith.constant 0 : i32
    return %c0_i32, %c0_i32_0 : i32, i32
  }
  func.func @transform_3(%arg0: i32) -> (i32, i32) {
    %c0_i32 = arith.constant 0 : i32
    %c0_i32_0 = arith.constant 0 : i32
    %c0_i32_1 = arith.constant 0 : i32
    return %c0_i32, %c0_i32_0 : i32, i32
  }
  func.func @transform_4(%arg0: i32) -> (i32, i32) {
    %c0_i32 = arith.constant 0 : i32
    %c0_i32_0 = arith.constant 0 : i32
    %c0_i32_1 = arith.constant 0 : i32
    return %c0_i32, %c0_i32_0 : i32, i32
  }
  func.func @transform_5(%arg0: i32) -> (i32, i32) {
    %c0_i32 = arith.constant 0 : i32
    %c0_i32_0 = arith.constant 0 : i32
    %c0_i32_1 = arith.constant 0 : i32
    return %c0_i32, %c0_i32_0 : i32, i32
  }
  func.func @transform_6(%arg0: i32) -> (i32, i32) {
    %c0_i32 = arith.constant 0 : i32
    %c0_i32_0 = arith.constant 0 : i32
    %c0_i32_1 = arith.constant 0 : i32
    return %c0_i32, %c0_i32_0 : i32, i32
  }
  func.func @transform_7(%arg0: i32) -> (i32, i32) {
    %c0_i32 = arith.constant 0 : i32
    %c0_i32_0 = arith.constant 0 : i32
    %c0_i32_1 = arith.constant 0 : i32
    return %c0_i32, %c0_i32_0 : i32, i32
  }
  func.func @transform_8(%arg0: i32) -> (i32, i32) {
    %c0_i32 = arith.constant 0 : i32
    %c0_i32_0 = arith.constant 0 : i32
    %c0_i32_1 = arith.constant 0 : i32
    return %c0_i32, %c0_i32_0 : i32, i32
  }
  func.func @transform_9(%arg0: i32) -> (i32, i32) {
    %c0_i32 = arith.constant 0 : i32
    %c0_i32_0 = arith.constant 0 : i32
    %c0_i32_1 = arith.constant 0 : i32
    return %c0_i32, %c0_i32_0 : i32, i32
  }
  func.func @transform_10(%arg0: i32) -> (i32, i32) {
    %c0_i32 = arith.constant 0 : i32
    %c0_i32_0 = arith.constant 0 : i32
    %c0_i32_1 = arith.constant 0 : i32
    return %c0_i32, %c0_i32_0 : i32, i32
  }
  func.func @transform_11(%arg0: i32) -> (i32, i32) {
    %c0_i32 = arith.constant 0 : i32
    %c0_i32_0 = arith.constant 0 : i32
    return %arg0, %c0_i32 : i32, i32
  }
}

</mosaic_0001>

<bundles_post_ra>
// kernel: tpu_custom_call.1
= control target key start
LH: loop header
LB: loop body
LE: loop exit
PB: predicated region body
PF: predicated region fallthrough
CT: control target
= control target key end

     0   :  { %s2213_s0 = inlined_call_operand.hbm [shape: f32[16,512], index: 0, kind: input, shape index: {}]   ;;  %s2214_s1 = inlined_call_operand.hbm [shape: f32[16,512], index: 1, kind: input, shape index: {}]   ;;  %s2215_s2 = inlined_call_operand.hbm [shape: bf16[512,256], index: 2, kind: input, shape index: {}]   ;;  %s2216_s3 = inlined_call_operand.vmem [shape: f32[1,256], index: 3, kind: input, shape index: {}]   ;;  %s2217_s4 = inlined_call_operand.hbm [shape: bf16[512,256], index: 4, kind: input, shape index: {}]   ;;  %s2218_s5 = inlined_call_operand.vmem [shape: f32[1,256], index: 5, kind: input, shape index: {}]   ;;  %s2219_s6 = inlined_call_operand.vmem [shape: f32[1,256], index: 6, kind: input, shape index: {}]   ;;  %s2220_s7 = inlined_call_operand.vmem [shape: f32[1,256], index: 7, kind: input, shape index: {}]   ;;  %s2221_s8 = inlined_call_operand.<no memory space> [shape: f32[1,1], index: 8, kind: input, shape index: {}]   ;;  %s2222_s9 = inlined_call_operand.hbm [shape: bf16[256,128], index: 9, kind: input, shape index: {}]   ;;  %s2223_s10 = inlined_call_operand.vmem [shape: f32[1,128], index: 10, kind: input, shape index: {}]   ;;  %s2224_s11 = inlined_call_operand.hbm [shape: bf16[16,128], index: 11, kind: output, shape index: {}]  }
   0x1   :  { %v16_v0 = vstv %s2221_s8 }
   0x2   :  { %17 = vst [vmem:[#allocation2] sm:$0x1] %v16_v0 }
   0x3   :  { %18 = vsyncpa [#allocation4], 0 }
   0x4   :  { %19 = vsyncpa [#allocation7], 0 }
   0x5   :  { %20 = vsyncpa [#allocation10], 0 }
   0x6   :  { %21 = vsyncpa [#allocation5], 0  ;;  %s1976_s19 = smov [#allocation6]   ;;  %s1836_s23 = scalar_lea.hbm %s2214_s1, 1024 }
   0x7   :  { %s39_s20 = sshll.u32 %s1976_s19, 4  ;;  %p1837_p0 = scmp.ne.s32.totalorder %s2214_s1, %s1836_s23  ;;  %s40_s20 = int_to_ptr.vmem [resolvable:$true] %s39_s20 }
   0x8   :  { %p1840_p1 = scmp.lt.u32.totalorder %s1836_s23, %s2214_s1 }
   0xa   :  { %p1842_p2 = pnand %p1840_p1, %p1837_p0 }
   0xc   :  { %1845 = shalt.err (!%p1842_p2)
}
   0xd   :  { %s1846_s8 = scalar_lea.vmem %s40_s20, 1024  ;;  %p1851_p4 = scmp.lt.s32.totalorder %s40_s20, %s40_s20 }
   0xe   :  { %p1847_p3 = scmp.ne.s32.totalorder %s40_s20, %s1846_s8  ;;  %p1852_p5 = scmp.lt.s32.totalorder %s1846_s8, %s1846_s8 }
  0x10   :  { %p1853_p6 = por %p1852_p5, %p1851_p4 }
  0x12   :  { %p1854_p7 = pnand %p1853_p6, %p1847_p3 }
  0x14   :  { %1857 = shalt.err (!%p1854_p7)
}
  0x15   :  { %s1977_s28 = smov 512   ;;  %s1978_s29 = smov 32  }
  0x16   :  { %45 = dma.hbm_to_vmem [thread:$0]  %s2214_s1, 1024, %s40_s20, [#allocation7], %s1977_s28, %s1977_s28, %s1978_s29  }
  0x17   :  { %s1979_s13 = smov [#allocation9]   ;;  %s1980_s15 = smov [#allocation3]  }
  0x18   :  { %s65_s14 = sshll.u32 %s1979_s13, 4  ;;  %s27_s16 = sshll.u32 %s1980_s15, 4  ;;  %s66_s14 = int_to_ptr.vmem [resolvable:$true] %s65_s14  ;;  %s28_s16 = int_to_ptr.vmem [resolvable:$true] %s27_s16 }
  0x19   :  { %s1858_s19 = scalar_lea.hbm %s2217_s4, 8192 }
  0x1a   :  { %p1859_p8 = scmp.ne.s32.totalorder %s2217_s4, %s1858_s19  ;;  %p1862_p9 = scmp.lt.u32.totalorder %s1858_s19, %s2217_s4 }
  0x1c   :  { %p1864_p10 = pnand %p1862_p9, %p1859_p8 }
  0x1e   :  { %1867 = shalt.err (!%p1864_p10)
}
  0x1f   :  { %s1868_s1 = scalar_lea.vmem %s66_s14, 8192  ;;  %p1873_p12 = scmp.lt.s32.totalorder %s66_s14, %s66_s14 }
  0x20   :  { %p1869_p11 = scmp.ne.s32.totalorder %s66_s14, %s1868_s1  ;;  %p1874_p13 = scmp.lt.s32.totalorder %s1868_s1, %s1868_s1 }
  0x22   :  { %p1875_p0 = por %p1874_p13, %p1873_p12 }
  0x24   :  { %p1876_p1 = pnand %p1875_p0, %p1869_p11 }
  0x26   :  { %1879 = shalt.err (!%p1876_p1)
}
  0x27   :  { %s1981_s20 = smov 128   ;;  %s1982_s25 = smov 8  }
  0x28   :  { %71 = dma.hbm_to_vmem [thread:$0]  %s2217_s4, 8192, %s66_s14, [#allocation10], %s1981_s20, %s1981_s20, %s1982_s25  }
  0x29   :  { %s1880_s12 = scalar_lea.hbm %s2213_s0, 1024 }
  0x2a   :  { %p1881_p2 = scmp.ne.s32.totalorder %s2213_s0, %s1880_s12  ;;  %p1884_p3 = scmp.lt.u32.totalorder %s1880_s12, %s2213_s0 }
  0x2c   :  { %p1886_p4 = pnand %p1884_p3, %p1881_p2 }
  0x2e   :  { %1889 = shalt.err (!%p1886_p4)
}
  0x2f   :  { %s1890_s19 = scalar_lea.vmem %s28_s16, 1024  ;;  %p1895_p6 = scmp.lt.s32.totalorder %s28_s16, %s28_s16 }
  0x30   :  { %p1891_p5 = scmp.ne.s32.totalorder %s28_s16, %s1890_s19  ;;  %p1896_p7 = scmp.lt.s32.totalorder %s1890_s19, %s1890_s19 }
  0x32   :  { %p1897_p8 = por %p1896_p7, %p1895_p6 }
  0x34   :  { %p1898_p9 = pnand %p1897_p8, %p1891_p5 }
  0x36   :  { %1901 = shalt.err (!%p1898_p9)
}
  0x37   :  { %33 = dma.hbm_to_vmem [thread:$0]  %s2213_s0, 1024, %s28_s16, [#allocation4], %s1977_s28, %s1977_s28, %s1978_s29  }
  0x38   :  { %s1983_s21 = smov [#allocation8]   ;;  %s1984_s23 = smov [#allocation11]  }
  0x39   :  { %s51_s22 = sshll.u32 %s1983_s21, 4  ;;  %s85_s24 = sshll.u32 %s1984_s23, 4  ;;  %s52_s22 = int_to_ptr.vmem [resolvable:$true] %s51_s22  ;;  %s86_s24 = int_to_ptr.vmem [resolvable:$true] %s85_s24 }
  0x3a   :  { %s1902_s27 = scalar_lea.hbm %s2215_s2, 8192 }
  0x3b   :  { %p1903_p10 = scmp.ne.s32.totalorder %s2215_s2, %s1902_s27  ;;  %p1906_p11 = scmp.lt.u32.totalorder %s1902_s27, %s2215_s2 }
  0x3d   :  { %p1908_p12 = pnand %p1906_p11, %p1903_p10 }
  0x3f   :  { %1911 = shalt.err (!%p1908_p12)
}
  0x40   :  { %s1912_s0 = scalar_lea.vmem %s52_s22, 8192  ;;  %p1917_p0 = scmp.lt.s32.totalorder %s52_s22, %s52_s22 }
  0x41   :  { %p1913_p13 = scmp.ne.s32.totalorder %s52_s22, %s1912_s0  ;;  %p1918_p1 = scmp.lt.s32.totalorder %s1912_s0, %s1912_s0 }
  0x43   :  { %p1919_p2 = por %p1918_p1, %p1917_p0 }
  0x45   :  { %p1920_p3 = pnand %p1919_p2, %p1913_p13 }
  0x47   :  { %1923 = shalt.err (!%p1920_p3)
}
  0x48   :  { %57 = dma.hbm_to_vmem [thread:$0]  %s2215_s2, 8192, %s52_s22, [#allocation7], %s1981_s20, %s1981_s20, %s1982_s25  }
  0x49   :  { %s1924_s17 = scalar_lea.hbm %s2222_s9, 2048 }
  0x4a   :  { %p1925_p4 = scmp.ne.s32.totalorder %s2222_s9, %s1924_s17  ;;  %p1928_p5 = scmp.lt.u32.totalorder %s1924_s17, %s2222_s9 }
  0x4c   :  { %p1930_p6 = pnand %p1928_p5, %p1925_p4 }
  0x4e   :  { %1933 = shalt.err (!%p1930_p6)
}
  0x4f   :  { %s1934_s21 = scalar_lea.vmem %s86_s24, 2048  ;;  %p1939_p8 = scmp.lt.s32.totalorder %s86_s24, %s86_s24 }
  0x50   :  { %p1935_p7 = scmp.ne.s32.totalorder %s86_s24, %s1934_s21  ;;  %p1940_p9 = scmp.lt.s32.totalorder %s1934_s21, %s1934_s21 }
  0x52   :  { %p1941_p10 = por %p1940_p9, %p1939_p8 }
  0x54   :  { %p1942_p11 = pnand %p1941_p10, %p1935_p7 }
  0x56   :  { %1945 = shalt.err (!%p1942_p11)
}
  0x57   :  { %s1985_s2 = smov 64   ;;  %s1986_s20 = smov 4  }
  0x58   :  { %91 = dma.hbm_to_vmem [thread:$0]  %s2222_s9, 2048, %s86_s24, [#allocation10], %s1985_s2, %s1985_s2, %s1986_s20  }
  0x59   :  { %1968 = dma.done.wait [#allocation4], 1024  }
  0x5a   :  { %1969 = vsyncadd [#allocation4], 4294966272 }
  0x5b   :  { %1970 = dma.done.wait [#allocation7], 9216  }
  0x5c   :  { %1971 = vsyncadd [#allocation7], 4294958080 }
  0x5d   :  { %1972 = dma.done.wait [#allocation10], 10240  }
  0x5e   :  { %1973 = vsyncadd [#allocation10], 4294957056  ;;  %v1620_v1 = vld [vmem:[#allocation8 + $0x4] ss:$8 sps:$4 sm:$0xff]   ;;  %v1624_v3 = vld [vmem:[#allocation8] ss:$8 sps:$4 sm:$0xff]  }
  0x5f   :  { %v1622_v2 = vld [vmem:[#allocation9 + $0x4] ss:$8 sps:$4 sm:$0xff]   ;;  %530 = vmatprep.subr.bf16.mxu0 %v1620_v1  ;;  %v1625_v4 = vld [vmem:[#allocation9] ss:$8 sps:$4 sm:$0xff]   ;;  %v1626_v5 = vld [vmem:[#allocation8 + $0x14] ss:$8 sps:$4 sm:$0xff]  }
  0x60   :  { %1016 = vmatprep.subr.bf16.mxu1 %v1622_v2  ;;  %531 = vmatpush1.bf16.msra.mxu0 %v1624_v3  ;;  %v1628_v6 = vld [vmem:[#allocation9 + $0x14] ss:$8 sps:$4 sm:$0xff]   ;;  %v1630_v7 = vld [vmem:[#allocation8 + $0x10] ss:$8 sps:$4 sm:$0xff]   ;;  %v1632_v9 = vld [vmem:[#allocation8 + $0x24] ss:$8 sps:$4 sm:$0xff]  }
  0x61   :  { %1017 = vmatpush1.bf16.msra.mxu1 %v1625_v4  ;;  %532 = vmatprep.subr.bf16.mxu0 %v1626_v5  ;;  %v1631_v8 = vld [vmem:[#allocation9 + $0x10] ss:$8 sps:$4 sm:$0xff]   ;;  %v1634_v10 = vld [vmem:[#allocation9 + $0x24] ss:$8 sps:$4 sm:$0xff]   ;;  %v1636_v11 = vld [vmem:[#allocation8 + $0x20] ss:$8 sps:$4 sm:$0xff]  }
  0x62   :  { %1018 = vmatprep.subr.bf16.mxu1 %v1628_v6  ;;  %v1637_v12 = vld [vmem:[#allocation9 + $0x20] ss:$8 sps:$4 sm:$0xff]   ;;  %v1638_v13 = vld [vmem:[#allocation8 + $0x34] ss:$8 sps:$4 sm:$0xff]   ;;  %v1642_v15 = vld [vmem:[#allocation8 + $0x30] ss:$8 sps:$4 sm:$0xff]  }
  0x63   :  { %v1640_v14 = vld [vmem:[#allocation9 + $0x34] ss:$8 sps:$4 sm:$0xff]   ;;  %v1643_v16 = vld [vmem:[#allocation9 + $0x30] ss:$8 sps:$4 sm:$0xff]   ;;  %v1644_v17 = vld [vmem:[#allocation8 + $0x44] ss:$8 sps:$4 sm:$0xff]  }
  0x64   :  { %533 = vmatpush1.bf16.msra.mxu0 %v1630_v7  ;;  %v1646_v18 = vld [vmem:[#allocation9 + $0x44] ss:$8 sps:$4 sm:$0xff]   ;;  %v1648_v19 = vld [vmem:[#allocation8 + $0x40] ss:$8 sps:$4 sm:$0xff]   ;;  %v1650_v21 = vld [vmem:[#allocation8 + $0x54] ss:$8 sps:$4 sm:$0xff]  }
  0x65   :  { %1019 = vmatpush1.bf16.msra.mxu1 %v1631_v8  ;;  %534 = vmatprep.subr.bf16.mxu0 %v1632_v9  ;;  %v1649_v20 = vld [vmem:[#allocation9 + $0x40] ss:$8 sps:$4 sm:$0xff]   ;;  %v1652_v22 = vld [vmem:[#allocation9 + $0x54] ss:$8 sps:$4 sm:$0xff]   ;;  %v1654_v23 = vld [vmem:[#allocation8 + $0x50] ss:$8 sps:$4 sm:$0xff]  }
  0x66   :  { %1020 = vmatprep.subr.bf16.mxu1 %v1634_v10  ;;  %v1655_v24 = vld [vmem:[#allocation9 + $0x50] ss:$8 sps:$4 sm:$0xff]   ;;  %v1656_v25 = vld [vmem:[#allocation8 + $0x64] ss:$8 sps:$4 sm:$0xff]   ;;  %v1660_v27 = vld [vmem:[#allocation8 + $0x60] ss:$8 sps:$4 sm:$0xff]  }
  0x67   :  { %v1658_v26 = vld [vmem:[#allocation9 + $0x64] ss:$8 sps:$4 sm:$0xff]   ;;  %v1661_v28 = vld [vmem:[#allocation9 + $0x60] ss:$8 sps:$4 sm:$0xff]   ;;  %v1662_v29 = vld [vmem:[#allocation8 + $0x74] ss:$8 sps:$4 sm:$0xff]  }
  0x68   :  { %535 = vmatpush1.bf16.msra.mxu0 %v1636_v11  ;;  %v1664_v30 = vld [vmem:[#allocation9 + $0x74] ss:$8 sps:$4 sm:$0xff]   ;;  %v1666_v31 = vld [vmem:[#allocation8 + $0x70] ss:$8 sps:$4 sm:$0xff]   ;;  %v1668_v33 = vld [vmem:[#allocation8 + $0x84] ss:$8 sps:$4 sm:$0xff]  }
  0x69   :  { %1021 = vmatpush1.bf16.msra.mxu1 %v1637_v12  ;;  %536 = vmatprep.subr.bf16.mxu0 %v1638_v13  ;;  %v1667_v32 = vld [vmem:[#allocation9 + $0x70] ss:$8 sps:$4 sm:$0xff]   ;;  %v1670_v34 = vld [vmem:[#allocation9 + $0x84] ss:$8 sps:$4 sm:$0xff]   ;;  %v1672_v35 = vld [vmem:[#allocation8 + $0x80] ss:$8 sps:$4 sm:$0xff]  }
  0x6a   :  { %1022 = vmatprep.subr.bf16.mxu1 %v1640_v14  ;;  %v1673_v36 = vld [vmem:[#allocation9 + $0x80] ss:$8 sps:$4 sm:$0xff]   ;;  %v1674_v37 = vld [vmem:[#allocation8 + $0x94] ss:$8 sps:$4 sm:$0xff]   ;;  %v1678_v39 = vld [vmem:[#allocation8 + $0x90] ss:$8 sps:$4 sm:$0xff]  }
  0x6b   :  { %v1676_v38 = vld [vmem:[#allocation9 + $0x94] ss:$8 sps:$4 sm:$0xff]   ;;  %v1679_v40 = vld [vmem:[#allocation9 + $0x90] ss:$8 sps:$4 sm:$0xff]   ;;  %v1680_v41 = vld [vmem:[#allocation8 + $0xa4] ss:$8 sps:$4 sm:$0xff]  }
  0x6c   :  { %537 = vmatpush1.bf16.msra.mxu0 %v1642_v15  ;;  %v1682_v42 = vld [vmem:[#allocation9 + $0xa4] ss:$8 sps:$4 sm:$0xff]   ;;  %v1684_v43 = vld [vmem:[#allocation8 + $0xa0] ss:$8 sps:$4 sm:$0xff]   ;;  %v1686_v45 = vld [vmem:[#allocation8 + $0xb4] ss:$8 sps:$4 sm:$0xff]  }
  0x6d   :  { %1023 = vmatpush1.bf16.msra.mxu1 %v1643_v16  ;;  %538 = vmatprep.subr.bf16.mxu0 %v1644_v17  ;;  %v1685_v44 = vld [vmem:[#allocation9 + $0xa0] ss:$8 sps:$4 sm:$0xff]   ;;  %v1688_v46 = vld [vmem:[#allocation9 + $0xb4] ss:$8 sps:$4 sm:$0xff]   ;;  %v1690_v47 = vld [vmem:[#allocation8 + $0xb0] ss:$8 sps:$4 sm:$0xff]  }
  0x6e   :  { %1024 = vmatprep.subr.bf16.mxu1 %v1646_v18  ;;  %v1691_v48 = vld [vmem:[#allocation9 + $0xb0] ss:$8 sps:$4 sm:$0xff]   ;;  %v111_v49 = vld [vmem:[#allocation3 + $0x8] sm:$0xff]  ;;  %v1698_v59 = vld [vmem:[#allocation8 + $0xd4] ss:$8 sps:$4 sm:$0xff]  }
  0x6f   :  { %v115_v50 = vld [vmem:[#allocation3 + $0x28] sm:$0xff]  ;;  %v1700_v60 = vld [vmem:[#allocation9 + $0xd4] ss:$8 sps:$4 sm:$0xff]   ;;  %v1702_v61 = vld [vmem:[#allocation8 + $0xd0] ss:$8 sps:$4 sm:$0xff]  }
  0x70   :  { %539 = vmatpush1.bf16.msra.mxu0 %v1648_v19  ;;  %v1692_v51 = vld [vmem:[#allocation8 + $0xc4] ss:$8 sps:$4 sm:$0xff]   ;;  %v119_v53 = vpack.c.bf16 %v115_v50, %v111_v49  ;;  %v1696_v57 = vld [vmem:[#allocation8 + $0xc0] ss:$8 sps:$4 sm:$0xff]   ;;  %v1703_v62 = vld [vmem:[#allocation9 + $0xd0] ss:$8 sps:$4 sm:$0xff]  }
  0x71   :  { %1025 = vmatpush1.bf16.msra.mxu1 %v1649_v20  ;;  %540 = vmatprep.subr.bf16.mxu0 %v1650_v21  ;;  %v1694_v52 = vld [vmem:[#allocation9 + $0xc4] ss:$8 sps:$4 sm:$0xff]   ;;  %v1697_v58 = vld [vmem:[#allocation9 + $0xc0] ss:$8 sps:$4 sm:$0xff]   ;;  %v1710_v3 = vld [vmem:[#allocation8 + $0xf4] ss:$8 sps:$4 sm:$0xff]  }
  0x72   :  { %1026 = vmatprep.subr.bf16.mxu1 %v1652_v22  ;;  %v123_v54 = vld [vmem:[#allocation6 + $0x8] sm:$0xff]  ;;  %562 = vmatprep.mubr.bf16.mxu0 %v119_v53  ;;  %v1712_v4 = vld [vmem:[#allocation9 + $0xf4] ss:$8 sps:$4 sm:$0xff]   ;;  %v1714_v5 = vld [vmem:[#allocation8 + $0xf0] ss:$8 sps:$4 sm:$0xff]  }
  0x73   :  { %v127_v55 = vld [vmem:[#allocation6 + $0x28] sm:$0xff]  ;;  %v1715_v6 = vld [vmem:[#allocation9 + $0xf0] ss:$8 sps:$4 sm:$0xff]   ;;  %v110_v7 = vld [vmem:[#allocation3] sm:$0xff] }
  0x74   :  { %541 = vmatpush1.bf16.msra.mxu0 %v1654_v23  ;;  %v131_v56 = vpack.c.bf16 %v127_v55, %v123_v54  ;;  %v1704_v63 = vld [vmem:[#allocation8 + $0xe4] ss:$8 sps:$4 sm:$0xff]   ;;  %v1708_v1 = vld [vmem:[#allocation8 + $0xe0] ss:$8 sps:$4 sm:$0xff]   ;;  %v1724_v17 = vld [vmem:[#allocation8 + $0x114] ss:$8 sps:$4 sm:$0xff]  }
  0x75   :  { %1027 = vmatpush1.bf16.msra.mxu1 %v1655_v24  ;;  %542 = vmatprep.subr.bf16.mxu0 %v1656_v25  ;;  %v1706_v0 = vld [vmem:[#allocation9 + $0xe4] ss:$8 sps:$4 sm:$0xff]   ;;  %v1709_v2 = vld [vmem:[#allocation9 + $0xe0] ss:$8 sps:$4 sm:$0xff]   ;;  %v1727_v18 = vld [vmem:[#allocation9 + $0x114] ss:$8 sps:$4 sm:$0xff]  }
  0x76   :  { %1028 = vmatprep.subr.bf16.mxu1 %v1658_v26  ;;  %1048 = vmatprep.mubr.bf16.mxu1 %v131_v56  ;;  %v1718_v8 = vld [vmem:[#allocation8 + $0x104] ss:$8 sps:$4 sm:$0xff]   ;;  %v1716_v13 = vld [vmem:[#allocation8 + $0x100] ss:$8 sps:$4 sm:$0xff]   ;;  %v1722_v19 = vld [vmem:[#allocation8 + $0x110] ss:$8 sps:$4 sm:$0xff]  }
  0x77   :  { %v114_v9 = vld [vmem:[#allocation3 + $0x20] sm:$0xff]  ;;  %v1725_v20 = vld [vmem:[#allocation9 + $0x110] ss:$8 sps:$4 sm:$0xff]   ;;  %v1736_v25 = vld [vmem:[#allocation8 + $0x134] ss:$8 sps:$4 sm:$0xff]  }
  0x78   :  { %543 = vmatpush1.bf16.msra.mxu0 %v1660_v27  ;;  %v122_v10 = vld [vmem:[#allocation6] sm:$0xff]  ;;  %v118_v15 = vpack.c.bf16 %v114_v9, %v110_v7  ;;  %v1739_v26 = vld [vmem:[#allocation9 + $0x134] ss:$8 sps:$4 sm:$0xff]   ;;  %v1734_v27 = vld [vmem:[#allocation8 + $0x130] ss:$8 sps:$4 sm:$0xff]  }
  0x79   :  { %1029 = vmatpush1.bf16.msra.mxu1 %v1661_v28  ;;  %544 = vmatprep.subr.bf16.mxu0 %v1662_v29  ;;  %v126_v11 = vld [vmem:[#allocation6 + $0x20] sm:$0xff]  ;;  %v1737_v28 = vld [vmem:[#allocation9 + $0x130] ss:$8 sps:$4 sm:$0xff]   ;;  %v1772_v55 = vld [vmem:[#allocation8 + $0x194] ss:$8 sps:$4 sm:$0xff]  }
  0x7a   :  { %1030 = vmatprep.subr.bf16.mxu1 %v1664_v30  ;;  %v1721_v12 = vld [vmem:[#allocation9 + $0x104] ss:$8 sps:$4 sm:$0xff]   ;;  %v1719_v14 = vld [vmem:[#allocation9 + $0x100] ss:$8 sps:$4 sm:$0xff]   ;;  %v130_v16 = vpack.c.bf16 %v126_v11, %v122_v10  ;;  %v1761_v49 = vld [vmem:[#allocation9 + $0x170] ss:$8 sps:$4 sm:$0xff]  }
  0x7b   :  { %v1730_v21 = vld [vmem:[#allocation8 + $0x124] ss:$8 sps:$4 sm:$0xff]   ;;  %v1728_v23 = vld [vmem:[#allocation8 + $0x120] ss:$8 sps:$4 sm:$0xff]   ;;  %v1775_v56 = vld [vmem:[#allocation9 + $0x194] ss:$8 sps:$4 sm:$0xff]  }
  0x7c   :  { %545 = vmatpush1.bf16.msra.mxu0 %v1666_v31  ;;  %v1733_v22 = vld [vmem:[#allocation9 + $0x124] ss:$8 sps:$4 sm:$0xff]   ;;  %v1731_v24 = vld [vmem:[#allocation9 + $0x120] ss:$8 sps:$4 sm:$0xff]   ;;  %v1796_v7 = vld [vmem:[#allocation8 + $0x1d4] ss:$8 sps:$4 sm:$0xff]  }
  0x7d   :  { %1031 = vmatpush1.bf16.msra.mxu1 %v1667_v32  ;;  %546 = vmatprep.subr.bf16.mxu0 %v1668_v33  ;;  %v1742_v29 = vld [vmem:[#allocation8 + $0x144] ss:$8 sps:$4 sm:$0xff]   ;;  %v1740_v31 = vld [vmem:[#allocation8 + $0x140] ss:$8 sps:$4 sm:$0xff]   ;;  %v1748_v33 = vld [vmem:[#allocation8 + $0x154] ss:$8 sps:$4 sm:$0xff]  }
  0x7e   :  { %1032 = vmatprep.subr.bf16.mxu1 %v1670_v34  ;;  %v1745_v30 = vld [vmem:[#allocation9 + $0x144] ss:$8 sps:$4 sm:$0xff]   ;;  %v1743_v32 = vld [vmem:[#allocation9 + $0x140] ss:$8 sps:$4 sm:$0xff]   ;;  %v1751_v34 = vld [vmem:[#allocation9 + $0x154] ss:$8 sps:$4 sm:$0xff]  }
  0x7f   :  { %v1764_v53 = vld [vmem:[#allocation8 + $0x180] ss:$8 sps:$4 sm:$0xff]   ;;  %v1794_v9 = vld [vmem:[#allocation8 + $0x1d0] ss:$8 sps:$4 sm:$0xff]   ;;  %v1802_v11 = vld [vmem:[#allocation8 + $0x1e4] ss:$8 sps:$4 sm:$0xff]  }
  0x80   :  { %547 = vmatpush1.bf16.msra.mxu0 %v1672_v35  ;;  %v1746_v35 = vld [vmem:[#allocation8 + $0x150] ss:$8 sps:$4 sm:$0xff]   ;;  %v1767_v54 = vld [vmem:[#allocation9 + $0x180] ss:$8 sps:$4 sm:$0xff]  }
  0x81   :  { %1033 = vmatpush1.bf16.msra.mxu1 %v1673_v36  ;;  %548 = vmatprep.subr.bf16.mxu0 %v1674_v37  ;;  %v1749_v36 = vld [vmem:[#allocation9 + $0x150] ss:$8 sps:$4 sm:$0xff]   ;;  %v1754_v37 = vld [vmem:[#allocation8 + $0x164] ss:$8 sps:$4 sm:$0xff]  }
  0x82   :  { %1034 = vmatprep.subr.bf16.mxu1 %v1676_v38  ;;  %v1757_v38 = vld [vmem:[#allocation9 + $0x164] ss:$8 sps:$4 sm:$0xff]   ;;  %v1797_v10 = vld [vmem:[#allocation9 + $0x1d0] ss:$8 sps:$4 sm:$0xff]  }
  0x84   :  { %549 = vmatpush1.bf16.msra.mxu0 %v1678_v39  ;;  %v1752_v39 = vld [vmem:[#allocation8 + $0x160] ss:$8 sps:$4 sm:$0xff]  }
  0x85   :  { %1035 = vmatpush1.bf16.msra.mxu1 %v1679_v40  ;;  %550 = vmatprep.subr.bf16.mxu0 %v1680_v41  ;;  %v1755_v40 = vld [vmem:[#allocation9 + $0x160] ss:$8 sps:$4 sm:$0xff]   ;;  %v113_v41 = vld [vmem:[#allocation3 + $0x18] sm:$0xff] }
  0x86   :  { %1036 = vmatprep.subr.bf16.mxu1 %v1682_v42  ;;  %v117_v42 = vld [vmem:[#allocation3 + $0x38] sm:$0xff] }
  0x88   :  { %551 = vmatpush1.bf16.msra.mxu0 %v1684_v43  ;;  %v125_v43 = vld [vmem:[#allocation6 + $0x18] sm:$0xff] }
  0x89   :  { %1037 = vmatpush1.bf16.msra.mxu1 %v1685_v44  ;;  %552 = vmatprep.subr.bf16.mxu0 %v1686_v45  ;;  %v1760_v44 = vld [vmem:[#allocation8 + $0x174] ss:$8 sps:$4 sm:$0xff]  }
  0x8a   :  { %1038 = vmatprep.subr.bf16.mxu1 %v1688_v46  ;;  %v1763_v45 = vld [vmem:[#allocation9 + $0x174] ss:$8 sps:$4 sm:$0xff]   ;;  %v121_v46 = vpack.c.bf16 %v117_v42, %v113_v41 }
  0x8c   :  { %553 = vmatpush1.bf16.msra.mxu0 %v1690_v47  ;;  %v129_v47 = vld [vmem:[#allocation6 + $0x38] sm:$0xff] }
  0x8d   :  { %1039 = vmatpush1.bf16.msra.mxu1 %v1691_v48  ;;  %554 = vmatprep.subr.bf16.mxu0 %v1692_v51  ;;  %v1758_v48 = vld [vmem:[#allocation8 + $0x170] ss:$8 sps:$4 sm:$0xff]   ;;  %v133_v50 = vpack.c.bf16 %v129_v47, %v125_v43  ;;  %v1766_v51 = vld [vmem:[#allocation8 + $0x184] ss:$8 sps:$4 sm:$0xff]  }
  0x8e   :  { %1040 = vmatprep.subr.bf16.mxu1 %v1694_v52  ;;  %v1769_v52 = vld [vmem:[#allocation9 + $0x184] ss:$8 sps:$4 sm:$0xff]  }
  0x90   :  { %555 = vmatpush1.bf16.msra.mxu0 %v1696_v57  ;;  %v1770_v57 = vld [vmem:[#allocation8 + $0x190] ss:$8 sps:$4 sm:$0xff]  }
  0x91   :  { %1041 = vmatpush1.bf16.msra.mxu1 %v1697_v58  ;;  %556 = vmatprep.subr.bf16.mxu0 %v1698_v59  ;;  %v1773_v58 = vld [vmem:[#allocation9 + $0x190] ss:$8 sps:$4 sm:$0xff]   ;;  %v1778_v59 = vld [vmem:[#allocation8 + $0x1a4] ss:$8 sps:$4 sm:$0xff]  }
  0x92   :  { %1042 = vmatprep.subr.bf16.mxu1 %v1700_v60  ;;  %v1781_v60 = vld [vmem:[#allocation9 + $0x1a4] ss:$8 sps:$4 sm:$0xff]  }
  0x94   :  { %557 = vmatpush1.bf16.msra.mxu0 %v1702_v61  ;;  %v1776_v61 = vld [vmem:[#allocation8 + $0x1a0] ss:$8 sps:$4 sm:$0xff]  }
  0x95   :  { %1043 = vmatpush1.bf16.msra.mxu1 %v1703_v62  ;;  %558 = vmatprep.subr.bf16.mxu0 %v1704_v63  ;;  %v1779_v62 = vld [vmem:[#allocation9 + $0x1a0] ss:$8 sps:$4 sm:$0xff]   ;;  %v1784_v63 = vld [vmem:[#allocation8 + $0x1b4] ss:$8 sps:$4 sm:$0xff]  }
  0x96   :  { %1044 = vmatprep.subr.bf16.mxu1 %v1706_v0  ;;  %v1787_v0 = vld [vmem:[#allocation9 + $0x1b4] ss:$8 sps:$4 sm:$0xff]  }
  0x98   :  { %559 = vmatpush1.bf16.msra.mxu0 %v1708_v1  ;;  %v1782_v1 = vld [vmem:[#allocation8 + $0x1b0] ss:$8 sps:$4 sm:$0xff]  }
  0x99   :  { %1045 = vmatpush1.bf16.msra.mxu1 %v1709_v2  ;;  %560 = vmatprep.subr.bf16.mxu0 %v1710_v3  ;;  %v1785_v2 = vld [vmem:[#allocation9 + $0x1b0] ss:$8 sps:$4 sm:$0xff]   ;;  %v1790_v3 = vld [vmem:[#allocation8 + $0x1c4] ss:$8 sps:$4 sm:$0xff]  }
  0x9a   :  { %1046 = vmatprep.subr.bf16.mxu1 %v1712_v4  ;;  %v1793_v4 = vld [vmem:[#allocation9 + $0x1c4] ss:$8 sps:$4 sm:$0xff]  }
  0x9c   :  { %561 = vmatpush1.bf16.msra.mxu0 %v1714_v5  ;;  %v1788_v5 = vld [vmem:[#allocation8 + $0x1c0] ss:$8 sps:$4 sm:$0xff]  }
  0x9d   :  { %1047 = vmatpush1.bf16.msra.mxu1 %v1715_v6  ;;  %573 = vmatprep.subr.bf16.mxu0 %v1718_v8  ;;  %v1791_v6 = vld [vmem:[#allocation9 + $0x1c0] ss:$8 sps:$4 sm:$0xff]   ;;  %v1799_v8 = vld [vmem:[#allocation9 + $0x1d4] ss:$8 sps:$4 sm:$0xff]  }
  0x9e   :  { %1059 = vmatprep.subr.bf16.mxu1 %v1721_v12  ;;  %v1805_v12 = vld [vmem:[#allocation9 + $0x1e4] ss:$8 sps:$4 sm:$0xff]  }
  0x9f   :  { %563 = vmatmul.mubr.bf16.vlgmr.msra.gmra.mrb[0].mxu0 %v118_v15  ;;  %v1808_v15 = vld [vmem:[#allocation8 + $0x1f4] ss:$8 sps:$4 sm:$0xff]  }
  0xa0   :  { %1049 = vmatmul.mubr.bf16.vlgmr.msra.gmra.mrb[0].mxu1 %v130_v16  ;;  %574 = vmatpush1.bf16.msra.mxu0 %v1716_v13  ;;  %v1800_v13 = vld [vmem:[#allocation8 + $0x1e0] ss:$8 sps:$4 sm:$0xff]   ;;  %v1811_v16 = vld [vmem:[#allocation9 + $0x1f4] ss:$8 sps:$4 sm:$0xff]  }
  0xa1   :  { %1060 = vmatpush1.bf16.msra.mxu1 %v1719_v14  ;;  %575 = vmatprep.subr.bf16.mxu0 %v1724_v17  ;;  %v1803_v14 = vld [vmem:[#allocation9 + $0x1e0] ss:$8 sps:$4 sm:$0xff]   ;;  %v1806_v17 = vld [vmem:[#allocation8 + $0x1f0] ss:$8 sps:$4 sm:$0xff]  }
  0xa2   :  { %1061 = vmatprep.subr.bf16.mxu1 %v1727_v18  ;;  %605 = vmatprep.mubr.bf16.mxu0 %v121_v46  ;;  %v1809_v18 = vld [vmem:[#allocation9 + $0x1f0] ss:$8 sps:$4 sm:$0xff]  }
  0xa3   :  { %1091 = vmatprep.mubr.bf16.mxu1 %v133_v50 }
  0xa4   :  { %576 = vmatpush1.bf16.msra.mxu0 %v1722_v19  ;;  %v112_v19 = vld [vmem:[#allocation3 + $0x10] sm:$0xff] }
  0xa5   :  { %1062 = vmatpush1.bf16.msra.mxu1 %v1725_v20  ;;  %577 = vmatprep.subr.bf16.mxu0 %v1730_v21  ;;  %v116_v20 = vld [vmem:[#allocation3 + $0x30] sm:$0xff] }
  0xa6   :  { %1063 = vmatprep.subr.bf16.mxu1 %v1733_v22  ;;  %v124_v21 = vld [vmem:[#allocation6 + $0x10] sm:$0xff] }
  0xa7   :  { %v128_v22 = vld [vmem:[#allocation6 + $0x30] sm:$0xff] }
  0xa8   :  { %578 = vmatpush1.bf16.msra.mxu0 %v1728_v23  ;;  %v120_v23 = vpack.c.bf16 %v116_v20, %v112_v19  ;;  %v1817_v19 = vld [vmem:[#allocation11 + $0x10] sm:$0xff]   ;;  %v1818_v20 = vld [vmem:[#allocation11 + $0x58] sm:$0xff]  }
  0xa9   :  { %1064 = vmatpush1.bf16.msra.mxu1 %v1731_v24  ;;  %579 = vmatprep.subr.bf16.mxu0 %v1736_v25  ;;  %v132_v24 = vpack.c.bf16 %v128_v22, %v124_v21  ;;  %v200_v25 = vlaneseq  ;;  %v1540_v22 = vld [vmem:[#allocation2] ss:$0 sm:$0xff] }
  0xaa   :  { %1065 = vmatprep.subr.bf16.mxu1 %v1739_v26 }
  0xab   :  { %v201_v26 = vshrl.u32 %v200_v25, 7 }
  0xac   :  { %580 = vmatpush1.bf16.msra.mxu0 %v1734_v27 }
  0xad   :  { %1066 = vmatpush1.bf16.msra.mxu1 %v1737_v28  ;;  %581 = vmatprep.subr.bf16.mxu0 %v1742_v29  ;;  %v202_v27 = vsub.s32 0, %v201_v26  ;;  %v198_v28 = vld [vmem:[%s2216_s3] sm:$0x3] }
  0xae   :  { %1067 = vmatprep.subr.bf16.mxu1 %v1745_v30  ;;  %v684_v29 = vld [vmem:[%s2218_s5] sm:$0x3]  ;;  %v206_v30 = vsub.s32 1, %v201_v26 }
  0xb0   :  { %582 = vmatpush1.bf16.msra.mxu0 %v1740_v31  ;;  %v203_v31 = vrot.slane %v198_v28, %v202_v27 }
  0xb1   :  { %1068 = vmatpush1.bf16.msra.mxu1 %v1743_v32  ;;  %583 = vmatprep.subr.bf16.mxu0 %v1748_v33  ;;  %v689_v32 = vrot.slane %v684_v29, %v202_v27  ;;  %v207_v33 = vrot.slane %v198_v28, %v206_v30 }
  0xb2   :  { %1069 = vmatprep.subr.bf16.mxu1 %v1751_v34  ;;  %v693_v34 = vrot.slane %v684_v29, %v206_v30 }
  0xb4   :  { %584 = vmatpush1.bf16.msra.mxu0 %v1746_v35  ;;  %v1106_v35 = vld [vmem:[%s2219_s6] sm:$0x3]  ;;  %s1988_s6 = smov [#allocation12]  }
  0xb5   :  { %1070 = vmatpush1.bf16.msra.mxu1 %v1749_v36  ;;  %585 = vmatprep.subr.bf16.mxu0 %v1754_v37  ;;  %v1128_v36 = vld [vmem:[%s2220_s7] sm:$0x3]  ;;  %v1111_v43 = vrot.slane %v1106_v35, %v202_v27  ;;  %s1398_s7 = sshll.u32 %s1988_s6, 4  ;;  %s1399_s7 = int_to_ptr.vmem [resolvable:$true] %s1398_s7 }
  0xb6   :  { %1071 = vmatprep.subr.bf16.mxu1 %v1757_v38  ;;  %v1137_v50 = vrot.slane %v1128_v36, %v206_v30  ;;  %s1946_s12 = scalar_lea.vmem %s1399_s7, 128  ;;  %p1951_p13 = scmp.lt.s32.totalorder %s1399_s7, %s1399_s7 }
  0xb7   :  { %p1947_p12 = scmp.ne.s32.totalorder %s1399_s7, %s1946_s12  ;;  %p1952_p0 = scmp.lt.s32.totalorder %s1946_s12, %s1946_s12 }
  0xb8   :  { %586 = vmatpush1.bf16.msra.mxu0 %v1752_v39 }
  0xb9   :  { %1072 = vmatpush1.bf16.msra.mxu1 %v1755_v40  ;;  %587 = vmatprep.subr.bf16.mxu0 %v1760_v44  ;;  %v1133_v44 = vrot.slane %v1128_v36, %v202_v27  ;;  %p1953_p1 = por %p1952_p0, %p1951_p13 }
  0xba   :  { %1073 = vmatprep.subr.bf16.mxu1 %v1763_v45 }
  0xbb   :  { %p1954_p2 = pnand %p1953_p1, %p1947_p12 }
  0xbc   :  { %588 = vmatpush1.bf16.msra.mxu0 %v1758_v48 }
  0xbd   :  { %1074 = vmatpush1.bf16.msra.mxu1 %v1761_v49  ;;  %589 = vmatprep.subr.bf16.mxu0 %v1766_v51  ;;  %v1115_v49 = vrot.slane %v1106_v35, %v206_v30 }
  0xbe   :  { %1075 = vmatprep.subr.bf16.mxu1 %v1769_v52 }
  0xc0   :  { %590 = vmatpush1.bf16.msra.mxu0 %v1764_v53 }
  0xc1   :  { %1076 = vmatpush1.bf16.msra.mxu1 %v1767_v54  ;;  %591 = vmatprep.subr.bf16.mxu0 %v1772_v55 }
  0xc2   :  { %1077 = vmatprep.subr.bf16.mxu1 %v1775_v56 }
  0xc4   :  { %592 = vmatpush1.bf16.msra.mxu0 %v1770_v57 }
  0xc5   :  { %1078 = vmatpush1.bf16.msra.mxu1 %v1773_v58  ;;  %593 = vmatprep.subr.bf16.mxu0 %v1778_v59 }
  0xc6   :  { %1079 = vmatprep.subr.bf16.mxu1 %v1781_v60 }
  0xc8   :  { %594 = vmatpush1.bf16.msra.mxu0 %v1776_v61 }
  0xc9   :  { %1080 = vmatpush1.bf16.msra.mxu1 %v1779_v62  ;;  %595 = vmatprep.subr.bf16.mxu0 %v1784_v63 }
  0xca   :  { %1081 = vmatprep.subr.bf16.mxu1 %v1787_v0 }
  0xcc   :  { %596 = vmatpush1.bf16.msra.mxu0 %v1782_v1 }
  0xcd   :  { %1082 = vmatpush1.bf16.msra.mxu1 %v1785_v2  ;;  %597 = vmatprep.subr.bf16.mxu0 %v1790_v3 }
  0xce   :  { %1083 = vmatprep.subr.bf16.mxu1 %v1793_v4 }
  0xd0   :  { %598 = vmatpush1.bf16.msra.mxu0 %v1788_v5 }
  0xd1   :  { %1084 = vmatpush1.bf16.msra.mxu1 %v1791_v6  ;;  %599 = vmatprep.subr.bf16.mxu0 %v1796_v7 }
  0xd2   :  { %1085 = vmatprep.subr.bf16.mxu1 %v1799_v8 }
  0xd4   :  { %600 = vmatpush1.bf16.msra.mxu0 %v1794_v9 }
  0xd5   :  { %1086 = vmatpush1.bf16.msra.mxu1 %v1797_v10  ;;  %601 = vmatprep.subr.bf16.mxu0 %v1802_v11 }
  0xd6   :  { %1087 = vmatprep.subr.bf16.mxu1 %v1805_v12 }
  0xd8   :  { %602 = vmatpush1.bf16.msra.mxu0 %v1800_v13  ;;  %v1987_v13 = vmov 0  }
  0xd9   :  { %1088 = vmatpush1.bf16.msra.mxu1 %v1803_v14  ;;  %603 = vmatprep.subr.bf16.mxu0 %v1808_v15  ;;  %v1812_v14 = vld [vmem:[#allocation11 + $0x40] sm:$0xff]  }
  0xda   :  { %1089 = vmatprep.subr.bf16.mxu1 %v1811_v16  ;;  %1618 = vset.pattern.permute.xlu0 %v1987_v13  ;;  %v1813_v15 = vld [vmem:[#allocation11] sm:$0xff]   ;;  %v1814_v16 = vld [vmem:[#allocation11 + $0x48] sm:$0xff]  }
  0xdb   :  { %1619 = vset.pattern.permute.xlu1 %v1987_v13 }
  0xdc   :  { %604 = vmatpush1.bf16.msra.mxu0 %v1806_v17  ;;  %v1815_v17 = vld [vmem:[#allocation11 + $0x8] sm:$0xff]  }
  0xdd   :  { %1090 = vmatpush1.bf16.msra.mxu1 %v1809_v18  ;;  %1567 = vmatprep.subr.bf16.mxu0 %v1812_v14  ;;  %v1816_v18 = vld [vmem:[#allocation11 + $0x50] sm:$0xff]  }
  0xdf   :  { %606 = vmatmul.mubr.bf16.vlgmr.msra.gmra.mrb[0].mxu0 %v120_v23 }
  0xe0   :  { %1092 = vmatmul.mubr.bf16.vlgmr.msra.gmra.mrb[0].mxu1 %v132_v24  ;;  %1568 = vmatpush3.bf16.msra.mxu0 %v1813_v15 }
  0xe1   :  { %1569 = vmatprep.subr.bf16.mxu0 %v1814_v16 }
  0xe4   :  { %1570 = vmatpush3.bf16.msra.mxu0 %v1815_v17 }
  0xe5   :  { %1571 = vmatprep.subr.bf16.mxu0 %v1816_v18 }
  0xe8   :  { %1572 = vmatpush3.bf16.msra.mxu0 %v1817_v19 }
  0xe9   :  { %1573 = vmatprep.subr.bf16.mxu0 %v1818_v20 }
 0x1b2   :  { %v607_v37 = vpop.f32.mrb[0].mxu0 }
 0x1b3   :  { %v1093_v38 = vpop.f32.mrb[0].mxu1  ;;  %v2139_v39 = vadd.f32 %v607_v37, %v203_v31  ;;  %v609_v41 = vpop.f32.mrb[1].mxu0 }
 0x1b4   :  { %v2141_v40 = vadd.f32 %v1093_v38, %v689_v32  ;;  %v1095_v42 = vpop.f32.mrb[1].mxu1  ;;  %v2143_v45 = vadd.f32 %v609_v41, %v207_v33  ;;  %v611_v47 = vpop.f32.mrb[2].mxu0  ;;  %v1819_v38 = vld [vmem:[#allocation11 + $0x18] sm:$0xff]  }
 0x1b5   :  { %v2145_v46 = vadd.f32 %v1095_v42, %v693_v34  ;;  %v1097_v48 = vpop.f32.mrb[2].mxu1  ;;  %v616_v51 = vmax.f32 %v2139_v39, 0.0  ;;  %v2149_v53 = vadd.f32 %v611_v47, %v203_v31  ;;  %v613_v55 = vpop.f32.mrb[3].mxu0  ;;  %1574 = vmatpush3.bf16.msra.mxu0 %v1819_v38  ;;  %v1820_v42 = vld [vmem:[#allocation11 + $0x60] sm:$0xff]   ;;  %v1822_v47 = vld [vmem:[#allocation11 + $0x68] sm:$0xff]  }
 0x1b6   :  { %v1102_v52 = vmax.f32 %v2141_v40, 0.0  ;;  %v2151_v54 = vadd.f32 %v1097_v48, %v689_v32  ;;  %v1099_v56 = vpop.f32.mrb[3].mxu1  ;;  %v617_v57 = vmax.f32 %v2143_v45, 0.0  ;;  %v2155_v59 = vadd.f32 %v613_v55, %v207_v33  ;;  %1575 = vmatprep.subr.bf16.mxu0 %v1820_v42 }
 0x1b7   :  { %v1103_v58 = vmax.f32 %v2145_v46, 0.0  ;;  %v2157_v60 = vadd.f32 %v1099_v56, %v693_v34  ;;  %v618_v61 = vmax.f32 %v2149_v53, 0.0  ;;  %v1118_v0 = vmul.f32 %v1111_v43, %v616_v51  ;;  %v1825_v56 = vld [vmem:[#allocation11 + $0x30] sm:$0xff]  }
 0x1b8   :  { %v1104_v62 = vmax.f32 %v2151_v54, 0.0  ;;  %v1140_v63 = vmul.f32 %v1133_v44, %v1102_v52  ;;  %v619_v1 = vmax.f32 %v2155_v59, 0.0  ;;  %v1119_v4 = vmul.f32 %v1115_v49, %v617_v57  ;;  %v1541_v54 = vld [vmem:[%s2223_s10] ss:$0 sm:$0xff] }
 0x1b9   :  { %v1105_v2 = vmax.f32 %v2157_v60, 0.0  ;;  %v1141_v3 = vmul.f32 %v1137_v50, %v1103_v58  ;;  %v1120_v5 = vmul.f32 %v1111_v43, %v618_v61  ;;  %v1821_v43 = vld [vmem:[#allocation11 + $0x20] sm:$0xff]  }
 0x1ba   :  { %v1142_v6 = vmul.f32 %v1133_v44, %v1104_v62  ;;  %v1121_v7 = vmul.f32 %v1115_v49, %v619_v1  ;;  %v1122_v10 = vadd.f32 %v1119_v4, %v1118_v0  ;;  %1576 = vmatpush3.bf16.msra.mxu0 %v1821_v43  ;;  %v1823_v49 = vld [vmem:[#allocation11 + $0x28] sm:$0xff]   ;;  %v1827_v0 = vld [vmem:[#allocation11 + $0x38] sm:$0xff]  }
 0x1bb   :  { %v1143_v8 = vmul.f32 %v1137_v50, %v1105_v2  ;;  %v1144_v9 = vadd.f32 %v1141_v3, %v1140_v63  ;;  %1577 = vmatprep.subr.bf16.mxu0 %v1822_v47  ;;  %v1824_v50 = vld [vmem:[#allocation11 + $0x70] sm:$0xff]   ;;  %v1826_v63 = vld [vmem:[#allocation11 + $0x78] sm:$0xff]  }
 0x1bc   :  { %1123 = vadd.xlane.f32.xlu0 %v1122_v10  ;;  %v1125_v12 = vadd.f32 %v1121_v7, %v1120_v5 }
 0x1bd   :  { %1145 = vadd.xlane.f32.xlu1 %v1144_v9  ;;  %v1147_v11 = vadd.f32 %v1143_v8, %v1142_v6 }
 0x1be   :  { %1578 = vmatpush3.bf16.msra.mxu0 %v1823_v49 }
 0x1bf   :  { %1579 = vmatprep.subr.bf16.mxu0 %v1824_v50 }
 0x1c0   :  { %1126 = vadd.xlane.f32.xlu0 %v1125_v12 }
 0x1c1   :  { %1148 = vadd.xlane.f32.xlu1 %v1147_v11 }
 0x1c2   :  { %1580 = vmatpush3.bf16.msra.mxu0 %v1825_v56 }
 0x1c3   :  { %1581 = vmatprep.subr.bf16.mxu0 %v1826_v63 }
 0x1c6   :  { %1582 = vmatpush3.bf16.msra.mxu0 %v1827_v0 }
 0x249   :  { %v1124_v23 = vpop.xlane.xlu0 %1123 }
 0x24a   :  { %v1146_v21 = vpop.xlane.xlu1 %1145 }
 0x24b   :  { %v1150_v24 = vadd.f32 %v1146_v21, %v1124_v23 }
 0x24d   :  { %v1159_v25 = vadd.f32 %v1540_v22, %v1150_v24  ;;  %v1127_v27 = vpop.xlane.xlu0 %1126 }
 0x24e   :  { %v1149_v26 = vpop.xlane.xlu1 %1148 }
 0x24f   :  { %v1161_v28 = vsub.f32 0.0, %v1159_v25  ;;  %v1151_v29 = vadd.f32 %v1149_v26, %v1127_v27 }
 0x251   :  { %v1163_v30 = vmul.f32 1.442695, %v1161_v28  ;;  %v1160_v31 = vadd.f32 %v1540_v22, %v1151_v29 }
 0x253   :  { %1828 = vpow2.f32 %v1163_v30  ;;  %v1162_v32 = vsub.f32 0.0, %v1160_v31 }
 0x255   :  { %v1165_v33 = vmul.f32 1.442695, %v1162_v32 }
 0x257   :  { %1830 = vpow2.f32 %v1165_v33 }
 0x25d   :  { %v1829_v34 = vpop.eup %1828 }
 0x25e   :  { %v1167_v35 = vadd.f32 1.0, %v1829_v34 }
 0x260   :  { %1832 = vrcp.f32 %v1167_v35 }
 0x261   :  { %v1831_v36 = vpop.eup %1830 }
 0x262   :  { %v1168_v37 = vadd.f32 1.0, %v1831_v36 }
 0x264   :  { %1834 = vrcp.f32 %v1168_v37 }
 0x26a   :  { %v1833_v41 = vpop.eup %1832 }
 0x26b   :  { %1175 = vperm.xlu0 %1618, %v1833_v41   ;;  %v1171_v48 = vsub.f32 1.0, %v1833_v41 }
 0x26e   :  { %v1835_v44 = vpop.eup %1834 }
 0x26f   :  { %1180 = vperm.xlu1 %1619, %v1835_v44   ;;  %v1172_v55 = vsub.f32 1.0, %v1835_v44 }
 0x273   :  { %1189 = vperm.xlu1 %1619, %v1171_v48  }
 0x277   :  { %1194 = vperm.xlu1 %1619, %v1172_v55  }
 0x2ea   :  { %v1176_v5 = vpop.permute.xlu0 %1175 }
 0x2eb   :  { %v1183_v8 = vmul.f32 %v1176_v5, %v616_v51  ;;  %v1184_v9 = vmul.f32 %v1176_v5, %v617_v57 }
 0x2ee   :  { %v1181_v3 = vpop.permute.xlu1 %1180 }
 0x2ef   :  { %v1185_v11 = vmul.f32 %v1181_v3, %v618_v61  ;;  %v1186_v12 = vmul.f32 %v1181_v3, %v619_v1 }
 0x2f2   :  { %v1190_v4 = vpop.permute.xlu1 %1189 }
 0x2f3   :  { %v1197_v6 = vmul.f32 %v1190_v4, %v1102_v52  ;;  %v1198_v7 = vmul.f32 %v1190_v4, %v1103_v58 }
 0x2f5   :  { %v1201_v52 = vadd.f32 %v1197_v6, %v1183_v8  ;;  %v1202_v58 = vadd.f32 %v1198_v7, %v1184_v9 }
 0x2f6   :  { %v1195_v10 = vpop.permute.xlu1 %1194 }
 0x2f7   :  { %v1199_v40 = vmul.f32 %v1195_v10, %v1104_v62  ;;  %v1200_v46 = vmul.f32 %v1195_v10, %v1105_v2 }
 0x2f9   :  { %v1203_v39 = vadd.f32 %v1199_v40, %v1185_v11  ;;  %v1204_v51 = vadd.f32 %v1200_v46, %v1186_v12 }
 0x2fb   :  { %v1205_v13 = vpack.c.bf16 %v1203_v39, %v1201_v52  ;;  %v1206_v45 = vpack.c.bf16 %v1204_v51, %v1202_v58 }
 0x2fd   :  { %1374 = vmatprep.mubr.bf16.mxu0 %v1206_v45 }
 0x2fe   :  { %1375 = vmatmul.mubr.bf16.vlgmr.msra.gmra.mrb[4].mxu0 %v1205_v13 }
 0x3d1   :  { %v1583_v57 = vpop.f32.mrb[4].mxu0 }
 0x3d2   :  { %v1584_v53 = vpop.f32.mrb[5].mxu0 }
 0x3d3   :  { %v1585_v61 = vadd.f32 %v1584_v53, %v1583_v57  ;;  %v1586_v14 = vpop.f32.mrb[6].mxu0 }
 0x3d4   :  { %v1587_v59 = vpop.f32.mrb[7].mxu0 }
 0x3d5   :  { %v1588_v62 = vadd.f32 %v1587_v59, %v1586_v14  ;;  %v1377_v60 = vadd.f32 %v1585_v61, %v1541_v54 }
 0x3d7   :  { %v1380_v1 = vadd.f32 %v1588_v62, %v1541_v54 }
 0x3d9   :  { %v1565_v2 = vpack.c.bf16 %v1380_v1, %v1377_v60 }
 0x3db   :  { %1566 = vst [vmem:[#allocation12] sm:$0xff] %v1565_v2  }
 0x3dc   :  { %1957 = shalt.err (!%p1954_p2)
}
 0x3dd   :  { %s1958_s10 = scalar_lea.hbm %s2224_s11, 128 }
 0x3de   :  { %p1959_p3 = scmp.ne.s32.totalorder %s2224_s11, %s1958_s10  ;;  %p1962_p4 = scmp.lt.u32.totalorder %s1958_s10, %s2224_s11 }
 0x3e0   :  { %p1964_p5 = pnand %p1962_p4, %p1959_p3 }
 0x3e2   :  { %1967 = shalt.err (!%p1964_p5)
}
 0x3e3   :  { %1404 = dma.vmem_to_hbm [thread:$0]  %s1399_s7, 128, %s2224_s11, [#allocation5], %s1985_s2, %s1985_s2, %s1986_s20  }
 0x3e4   :  { %1974 = dma.done.wait [#allocation5], 128  }
 0x3e5   :  { %1975 = vsyncadd [#allocation5], 4294967168 }
 0x3e6   :  { %1408 = vsyncpa [#allocation4], 1 }
 0x3e7   :  { %1409 = vsyncpa [#allocation7], 1 }
 0x3e8   :  { %1410 = vsyncpa [#allocation10], 1 }
 0x3e9   :  { %1411 = vsyncpa [#allocation5], 1 }

</bundles_post_ra>
